<compile_context>
chip_gen: v7x
topology: tpu7x:2x2x1
jax: 0.10.0
libtpu: 0.0.40
codegen_flags: <defaults>
</compile_context>

<pallas_src>
import functools

import jax
import jax.numpy as jnp
from jax import lax
from jax.experimental import pallas as pl
from jax.experimental.pallas import tpu as pltpu

_LANE = 128
_SUBLANE = 8


def _round_down(x, m):
    return (x // m) * m


def _round_up(x, m):
    return -(-x // m) * m


def _vmem_capacity_bytes():
    """Per-generation VMEM capacity (v5e/v6e: 128 MiB, v7x: 64 MiB)."""
    try:
        info = pltpu.get_tpu_info()
        cap = getattr(info, "vmem_capacity_bytes", None)
        if cap:
            return int(cap)
    except Exception:
        pass
    return 64 << 20  # conservative default (v7x physical VMEM)


def _pick_tile_c(c, rows, x_bytes, y_bytes, vmem_budget, want_steps):
    """Largest lane tile (multiple of 128, <= C) whose double-buffered
    (rows, tile_c) x-in + y-out working set fits the VMEM budget, targeting
    ~4 MiB per x buffer (measured: >=512-lane tiles reach ~85% of the HBM
    roofline vs ~29% at 128 lanes -- this op is purely HBM-bound)."""
    if c <= _LANE:
        return c
    max_tile = _round_down(c, _LANE)
    target_x_buf = 4 << 20
    budget = max(vmem_budget - (4 << 20), 1 << 20)      # headroom for params etc.
    per_lane = rows * (x_bytes + y_bytes) * 2           # double-buffered in + out
    by_target = max(_round_down(target_x_buf // max(rows * x_bytes, 1), _LANE), _LANE)
    by_budget = max(_round_down(budget // max(per_lane, 1), _LANE), _LANE)
    tile = max(_LANE, min(max_tile, by_target, by_budget))
    # v7x megacore: prefer >= want_steps grid steps so both TensorCores get
    # work, as long as each step still moves a reasonably large (>=512 lane)
    # tile; below that per-step overhead costs more than the second core buys.
    if want_steps > 1 and pl.cdiv(c, tile) < want_steps:
        split = _round_up(pl.cdiv(max_tile, want_steps), _LANE)
        if split >= 4 * _LANE:
            tile = min(tile, split)
    return tile


def _row_tile(ref, c, grid_c):
    """Current C tile from a grid-resident (grid_c, tile_c) param ref."""
    if grid_c == 1:
        return ref[...]
    return ref[pl.ds(c, 1), :]                    # dynamic sublane row select


def _sep_bn_train_kernel(x_ref, rm_ref, rv_ref, w_ref, b_ref,
                         y_ref, nrm_ref, nrv_ref,
                         *, eps, momentum, n_batch, tile_c, grid_c, row_chunk):
    c = pl.program_id(0)
    w = _row_tile(w_ref, c, grid_c)               # (1, tile_c) f32, grid-resident
    b = _row_tile(b_ref, c, grid_c)
    rm = _row_tile(rm_ref, c, grid_c)
    rv = _row_tile(rv_ref, c, grid_c)

    n = n_batch
    inv_n = 1.0 / float(n)

    if row_chunk >= n:
        # Small batch: single-shot two-pass (whole (N, tile_c) tile fits vregs).
        x = x_ref[...].astype(jnp.float32)
        mean = jnp.sum(x, axis=0, keepdims=True) * inv_n
        diff = x - mean
        var_b = jnp.sum(diff * diff, axis=0, keepdims=True) * inv_n
        inv = lax.rsqrt(var_b + eps)                              # EUP slot
        y_ref[...] = (diff * (w * inv) + b).astype(y_ref.dtype)
    else:
        # Large batch: chunk the (VMEM-resident) x tile so per-chunk live vregs
        # stay bounded -- VMEM re-reads are cheap (3 vld slots/cycle), spills
        # stealing the vst slot are not.
        rc = row_chunk
        n_full = n // rc
        rem = n - n_full * rc
        zeros = jnp.zeros((1, tile_c), jnp.float32)

        def _chunk(i):
            off = pl.multiple_of(i * rc, _SUBLANE)
            return x_ref[pl.ds(off, rc), :].astype(jnp.float32)

        # pass 1: mean
        def sum_body(i, acc):
            return acc + jnp.sum(_chunk(i), axis=0, keepdims=True)
        total = lax.fori_loop(0, n_full, sum_body, zeros)
        if rem:
            xt = x_ref[pl.ds(n_full * rc, rem), :].astype(jnp.float32)
            total = total + jnp.sum(xt, axis=0, keepdims=True)
        mean = total * inv_n

        # pass 2: biased variance (two-pass form for numerical safety)
        def ss_body(i, acc):
            d = _chunk(i) - mean
            return acc + jnp.sum(d * d, axis=0, keepdims=True)
        ss = lax.fori_loop(0, n_full, ss_body, zeros)
        if rem:
            d = x_ref[pl.ds(n_full * rc, rem), :].astype(jnp.float32) - mean
            ss = ss + jnp.sum(d * d, axis=0, keepdims=True)
        var_b = ss * inv_n

        inv = lax.rsqrt(var_b + eps)                              # EUP slot
        scale = w * inv
        shift = b - mean * scale

        # pass 3: normalize + store
        def norm_body(i, carry):
            off = pl.multiple_of(i * rc, _SUBLANE)
            xi = x_ref[pl.ds(off, rc), :].astype(jnp.float32)
            y_ref[pl.ds(off, rc), :] = (xi * scale + shift).astype(y_ref.dtype)
            return carry
        lax.fori_loop(0, n_full, norm_body, 0)
        if rem:
            off = n_full * rc
            xi = x_ref[pl.ds(off, rem), :].astype(jnp.float32)
            y_ref[pl.ds(off, rem), :] = (xi * scale + shift).astype(y_ref.dtype)

    # Updated running stats for the selected timestep (unbiased variance).
    var_u = var_b * (float(n) / float(n - 1))
    nrm_ref[...] = (1.0 - momentum) * rm + momentum * mean
    nrv_ref[...] = (1.0 - momentum) * rv + momentum * var_u


def _sep_bn_eval_kernel(x_ref, rm_ref, rv_ref, w_ref, b_ref, y_ref,
                        *, eps, grid_c):
    c = pl.program_id(1)
    rm = _row_tile(rm_ref, c, grid_c)
    rv = _row_tile(rv_ref, c, grid_c)
    w = _row_tile(w_ref, c, grid_c)
    b = _row_tile(b_ref, c, grid_c)
    inv = lax.rsqrt(rv + eps)                                     # EUP slot
    scale = w * inv
    shift = b - rm * scale
    x = x_ref[...].astype(jnp.float32)
    y_ref[...] = (x * scale + shift).astype(y_ref.dtype)


def separated_batch_norm_1d(x, time, running_mean_all, running_var_all,
                            weight=None, bias=None, *, eps=1e-5, momentum=0.1,
                            training=True, row_chunk=None):
    """Forward pass of SeparatedBatchNorm1d.

    x: (N, C), any float dtype (kept native; upcast to f32 inside the kernel)
    time: python int or int32 scalar (clamped to [0, max_length - 1])
    running_mean_all / running_var_all: (max_length, C)
    weight / bias: (C,) or None (affine=False)
    Returns (y, new_running_mean_t, new_running_var_t).
    """
    N, C = x.shape
    T = running_mean_all.shape[0]
    assert running_mean_all.shape == (T, C) and running_var_all.shape == (T, C)
    if training and N < 2:
        raise ValueError("batch_norm in training mode needs batch size > 1")

    if weight is None:
        weight = jnp.ones((C,), jnp.float32)
    if bias is None:
        bias = jnp.zeros((C,), jnp.float32)

    x_bytes = x.dtype.itemsize
    y_bytes = x_bytes

    vmem_cap = _vmem_capacity_bytes()
    vmem_budget = min((vmem_cap * 3) // 4, 96 << 20)   # per-generation headroom

    if training:
        # Full batch per tile (stats need all rows in one grid step).
        # TODO(synk): very large N needs a second "arbitrary" grid axis over N
        # with sum / sum-of-squares VMEM accumulators and a two-pass finalize.
        tile_n, grid_n = N, 1
        want_steps = 2
    else:
        tile_n = N if N <= 1024 else 1024
        grid_n = pl.cdiv(N, tile_n)
        want_steps = 2 if grid_n < 2 else 1

    tile_c = _pick_tile_c(C, tile_n, x_bytes, y_bytes, vmem_budget, want_steps)
    grid_c = pl.cdiv(C, tile_c)
    c_res = grid_c * tile_c                        # resident-param row width >= C

    # Tiny side inputs: select the (clamped) timestep row in the wrapper (reads
    # only (1, C) of the (T, C) stack), pad only these small rows to c_res, and
    # reshape to (grid_c, tile_c) so they stay VMEM-resident across the whole
    # grid (constant index_map -> fetched once, no per-step param DMAs).
    t_idx = jnp.clip(jnp.asarray(time, jnp.int32), 0, T - 1)
    rm_row = lax.dynamic_slice_in_dim(running_mean_all, t_idx, 1, 0).astype(jnp.float32)
    rv_row = lax.dynamic_slice_in_dim(running_var_all, t_idx, 1, 0).astype(jnp.float32)
    w_row = weight.astype(jnp.float32).reshape(1, C)
    b_row = bias.astype(jnp.float32).reshape(1, C)

    def _prep(row, pad_value=0.0):
        if c_res != C:
            row = jnp.pad(row, ((0, 0), (0, c_res - C)), constant_values=pad_value)
        return row.reshape(grid_c, tile_c)

    rm_p = _prep(rm_row)
    rv_p = _prep(rv_row, 1.0)
    w_p = _prep(w_row)
    b_p = _prep(b_row)

    # VMEM limit: double-buffered x + y tiles plus resident params plus slack.
    x_buf = tile_n * tile_c * x_bytes
    y_buf = tile_n * tile_c * y_bytes
    need = 2 * (x_buf + y_buf) + 4 * c_res * 4 + (4 << 20)
    vmem_limit = int(min(max(need, 32 << 20), vmem_budget))

    if row_chunk is None:
        # Keep per-chunk live f32 vregs around ~128 KiB (vreg file is 256 KiB).
        row_chunk = max(_SUBLANE, _round_down(32768 // max(tile_c, 1), _SUBLANE))
    else:
        row_chunk = max(_SUBLANE, _round_down(int(row_chunk), _SUBLANE))

    param_block = (grid_c, tile_c)

    if training:
        kernel = functools.partial(
            _sep_bn_train_kernel, eps=float(eps), momentum=float(momentum),
            n_batch=N, tile_c=tile_c, grid_c=grid_c, row_chunk=row_chunk)
        grid_spec = pltpu.PrefetchScalarGridSpec(
            num_scalar_prefetch=0,
            grid=(grid_c,),
            in_specs=[
                pl.BlockSpec((N, tile_c), lambda c: (0, c)),       # x (streamed)
                pl.BlockSpec(param_block, lambda c: (0, 0)),       # rm (resident)
                pl.BlockSpec(param_block, lambda c: (0, 0)),       # rv (resident)
                pl.BlockSpec(param_block, lambda c: (0, 0)),       # weight
                pl.BlockSpec(param_block, lambda c: (0, 0)),       # bias
            ],
            out_specs=[
                pl.BlockSpec((N, tile_c), lambda c: (0, c)),       # y
                pl.BlockSpec((1, tile_c), lambda c: (0, c)),       # new running mean
                pl.BlockSpec((1, tile_c), lambda c: (0, c)),       # new running var
            ],
        )
        y, nrm, nrv = pl.pallas_call(
            kernel,
            grid_spec=grid_spec,
            out_shape=(
                jax.ShapeDtypeStruct((N, C), x.dtype),
                jax.ShapeDtypeStruct((1, C), jnp.float32),
                jax.ShapeDtypeStruct((1, C), jnp.float32),
            ),
            compiler_params=pltpu.CompilerParams(
                dimension_semantics=("parallel",),
                vmem_limit_bytes=vmem_limit),
        )(x, rm_p, rv_p, w_p, b_p)
        # TODO(synk): optionally write the updated row back into the (T, C)
        # stats stack in place via input_output_aliases if the caller keeps the
        # full stack functionally.
        return y, nrm[0], nrv[0]

    # Eval: pure streaming normalize; running stats are returned unchanged.
    kernel = functools.partial(_sep_bn_eval_kernel, eps=float(eps), grid_c=grid_c)
    grid_spec = pltpu.PrefetchScalarGridSpec(
        num_scalar_prefetch=0,
        grid=(grid_n, grid_c),
        in_specs=[
            pl.BlockSpec((tile_n, tile_c), lambda n, c: (n, c)),   # x (streamed)
            pl.BlockSpec(param_block, lambda n, c: (0, 0)),        # rm (resident)
            pl.BlockSpec(param_block, lambda n, c: (0, 0)),        # rv (resident)
            pl.BlockSpec(param_block, lambda n, c: (0, 0)),        # weight
            pl.BlockSpec(param_block, lambda n, c: (0, 0)),        # bias
        ],
        out_specs=pl.BlockSpec((tile_n, tile_c), lambda n, c: (n, c)),
    )
    y = pl.pallas_call(
        kernel,
        grid_spec=grid_spec,
        out_shape=jax.ShapeDtypeStruct((N, C), x.dtype),
        compiler_params=pltpu.CompilerParams(
            dimension_semantics=("parallel", "parallel"),
            vmem_limit_bytes=vmem_limit),
    )(x, rm_p, rv_p, w_p, b_p)
    return y, rm_row[0], rv_row[0]


def _reference(x, time, rm_all, rv_all, w, b, eps, momentum, training):
    t = min(max(int(time), 0), rm_all.shape[0] - 1)
    rm, rv = rm_all[t], rv_all[t]
    xf = x.astype(jnp.float32)
    if training:
        n = x.shape[0]
        mean = jnp.mean(xf, axis=0)
        var_b = jnp.mean((xf - mean) ** 2, axis=0)
        y = ((xf - mean) / jnp.sqrt(var_b + eps) * w + b).astype(x.dtype)
        var_u = var_b * (n / (n - 1))
        nrm = (1 - momentum) * rm + momentum * mean
        nrv = (1 - momentum) * rv + momentum * var_u
    else:
        y = ((xf - rm) / jnp.sqrt(rv + eps) * w + b).astype(x.dtype)
        nrm, nrv = rm, rv
    return y, nrm, nrv


if __name__ == "__main__":
    key = jax.random.PRNGKey(0)
    eps, momentum = 1e-5, 0.1

    # --- Case 1: training, C=32 (C < 128, single full-extent tile), time=3 ---
    num_features, max_length, batch, time = 32, 8, 8, 3
    k1, k2, key = jax.random.split(key, 3)
    x = jax.random.normal(k1, (batch, num_features), dtype=jnp.float32)
    weight = jax.random.uniform(k2, (num_features,), dtype=jnp.float32)
    bias = jnp.zeros((num_features,), jnp.float32)
    rm_all = jnp.zeros((max_length, num_features), jnp.float32)
    rv_all = jnp.ones((max_length, num_features), jnp.float32)

    y, nrm, nrv = separated_batch_norm_1d(
        x, time, rm_all, rv_all, weight, bias,
        eps=eps, momentum=momentum, training=True)
    jax.block_until_ready((y, nrm, nrv))
    y_r, nrm_r, nrv_r = _reference(x, time, rm_all, rv_all, weight, bias,
                                   eps, momentum, training=True)
    assert jnp.allclose(y, y_r, atol=1e-4, rtol=1e-4)
    assert jnp.allclose(nrm, nrm_r, atol=1e-5, rtol=1e-5)
    assert jnp.allclose(nrv, nrv_r, atol=1e-5, rtol=1e-5)

    # --- Case 2: eval, C=256 (lane-dense), time clamped (time >= max_length) --
    num_features, max_length, batch, time = 256, 8, 8, 10
    k1, k2, k3, k4, key = jax.random.split(key, 5)
    x = jax.random.normal(k1, (batch, num_features), dtype=jnp.float32)
    weight = jax.random.uniform(k2, (num_features,), dtype=jnp.float32)
    bias = jnp.zeros((num_features,), jnp.float32)
    rm_all = 0.1 * jax.random.normal(k3, (max_length, num_features), jnp.float32)
    rv_all = 1.0 + 0.1 * jax.random.uniform(k4, (max_length, num_features), jnp.float32)

    y, nrm, nrv = separated_batch_norm_1d(
        x, time, rm_all, rv_all, weight, bias,
        eps=eps, momentum=momentum, training=False)
    jax.block_until_ready((y, nrm, nrv))
    y_r, nrm_r, nrv_r = _reference(x, time, rm_all, rv_all, weight, bias,
                                   eps, momentum, training=False)
    assert jnp.allclose(y, y_r, atol=1e-4, rtol=1e-4)
    assert jnp.allclose(nrm, nrm_r, atol=1e-5, rtol=1e-5)
    assert jnp.allclose(nrv, nrv_r, atol=1e-5, rtol=1e-5)

    # --- Case 3: training, C=200 (ragged last lane tile, grid_c=2), N=40,
    #     forced row_chunk=16 to exercise the chunked mean/var/normalize path --
    num_features, max_length, batch, time = 200, 6, 40, 0
    k1, k2, k3, k4, k5, key = jax.random.split(key, 6)
    x = jax.random.normal(k1, (batch, num_features), dtype=jnp.float32) * 2.0 + 0.5
    weight = jax.random.uniform(k2, (num_features,), dtype=jnp.float32)
    bias = 0.1 * jax.random.normal(k3, (num_features,), dtype=jnp.float32)
    rm_all = 0.1 * jax.random.normal(k4, (max_length, num_features), jnp.float32)
    rv_all = 1.0 + 0.1 * jax.random.uniform(k5, (max_length, num_features), jnp.float32)

    y, nrm, nrv = separated_batch_norm_1d(
        x, time, rm_all, rv_all, weight, bias,
        eps=eps, momentum=momentum, training=True, row_chunk=16)
    jax.block_until_ready((y, nrm, nrv))
    y_r, nrm_r, nrv_r = _reference(x, time, rm_all, rv_all, weight, bias,
                                   eps, momentum, training=True)
    assert jnp.allclose(y, y_r, atol=1e-4, rtol=1e-4)
    assert jnp.allclose(nrm, nrm_r, atol=1e-5, rtol=1e-5)
    assert jnp.allclose(nrv, nrv_r, atol=1e-4, rtol=1e-4)

    print("KERNEL_OK")
</pallas_src>

<mosaic_0001>
module attributes {stable_mosaic.version = 11 : i64} {
  func.func @_sep_bn_train_kernel(%arg0: i32, %arg1: memref<8x32xf32, #tpu.memory_space<vmem>>, %arg2: memref<1x32xf32, #tpu.memory_space<vmem>>, %arg3: memref<1x32xf32, #tpu.memory_space<vmem>>, %arg4: memref<1x32xf32, #tpu.memory_space<vmem>>, %arg5: memref<1x32xf32, #tpu.memory_space<vmem>>, %arg6: memref<8x32xf32, #tpu.memory_space<vmem>>, %arg7: memref<1x32xf32, #tpu.memory_space<vmem>>, %arg8: memref<1x32xf32, #tpu.memory_space<vmem>>) attributes {dimension_semantics = [#tpu.dimension_semantics<parallel>], iteration_bounds = array<i64: 1>, scalar_prefetch = 0 : i64, scratch_operands = 0 : i64, tpu.core_type = #tpu.core_type<tc>, window_params = [{transform_indices = @transform_0, window_bounds = array<i64: 8, 32>}, {pipeline_mode = #tpu.pipeline_mode<synchronous>, transform_indices = @transform_1, window_bounds = array<i64: 1, 32>}, {pipeline_mode = #tpu.pipeline_mode<synchronous>, transform_indices = @transform_2, window_bounds = array<i64: 1, 32>}, {pipeline_mode = #tpu.pipeline_mode<synchronous>, transform_indices = @transform_3, window_bounds = array<i64: 1, 32>}, {pipeline_mode = #tpu.pipeline_mode<synchronous>, transform_indices = @transform_4, window_bounds = array<i64: 1, 32>}, {transform_indices = @transform_5, window_bounds = array<i64: 8, 32>}, {transform_indices = @transform_6, window_bounds = array<i64: 1, 32>}, {transform_indices = @transform_7, window_bounds = array<i64: 1, 32>}]} {
    %c0 = arith.constant 0 : index
    %c0_0 = arith.constant 0 : index
    %0 = vector.load %arg4[%c0, %c0_0] : memref<1x32xf32, #tpu.memory_space<vmem>>, vector<1x32xf32>
    %c0_1 = arith.constant 0 : index
    %c0_2 = arith.constant 0 : index
    %1 = vector.load %arg5[%c0_1, %c0_2] : memref<1x32xf32, #tpu.memory_space<vmem>>, vector<1x32xf32>
    %c0_3 = arith.constant 0 : index
    %c0_4 = arith.constant 0 : index
    %2 = vector.load %arg2[%c0_3, %c0_4] : memref<1x32xf32, #tpu.memory_space<vmem>>, vector<1x32xf32>
    %c0_5 = arith.constant 0 : index
    %c0_6 = arith.constant 0 : index
    %3 = vector.load %arg3[%c0_5, %c0_6] : memref<1x32xf32, #tpu.memory_space<vmem>>, vector<1x32xf32>
    %c0_7 = arith.constant 0 : index
    %c0_8 = arith.constant 0 : index
    %4 = vector.load %arg1[%c0_7, %c0_8] : memref<8x32xf32, #tpu.memory_space<vmem>>, vector<8x32xf32>
    %cst = arith.constant dense<0.000000e+00> : vector<32xf32>
    %5 = vector.multi_reduction <add>, %4, %cst [0] : vector<8x32xf32> to vector<32xf32>
    %6 = vector.shape_cast %5 : vector<32xf32> to vector<1x32xf32>
    %cst_9 = arith.constant 1.250000e-01 : f32
    %7 = vector.broadcast %cst_9 : f32 to vector<1x32xf32>
    %8 = arith.mulf %6, %7 : vector<1x32xf32>
    %9 = vector.broadcast %8 : vector<1x32xf32> to vector<8x32xf32>
    %10 = arith.subf %4, %9 : vector<8x32xf32>
    %11 = arith.mulf %10, %10 : vector<8x32xf32>
    %cst_10 = arith.constant dense<0.000000e+00> : vector<32xf32>
    %12 = vector.multi_reduction <add>, %11, %cst_10 [0] : vector<8x32xf32> to vector<32xf32>
    %13 = vector.shape_cast %12 : vector<32xf32> to vector<1x32xf32>
    %cst_11 = arith.constant 1.250000e-01 : f32
    %14 = vector.broadcast %cst_11 : f32 to vector<1x32xf32>
    %15 = arith.mulf %13, %14 : vector<1x32xf32>
    %cst_12 = arith.constant 9.99999974E-6 : f32
    %16 = vector.broadcast %cst_12 : f32 to vector<1x32xf32>
    %17 = arith.addf %15, %16 : vector<1x32xf32>
    %18 = math.rsqrt %17 : vector<1x32xf32>
    %19 = arith.mulf %0, %18 : vector<1x32xf32>
    %20 = vector.broadcast %19 : vector<1x32xf32> to vector<8x32xf32>
    %21 = arith.mulf %10, %20 : vector<8x32xf32>
    %22 = vector.broadcast %1 : vector<1x32xf32> to vector<8x32xf32>
    %23 = arith.addf %21, %22 : vector<8x32xf32>
    %c0_13 = arith.constant 0 : index
    %c0_14 = arith.constant 0 : index
    %24 = vector.load %arg6[%c0_13, %c0_14] : memref<8x32xf32, #tpu.memory_space<vmem>>, vector<8x32xf32>
    tpu.vector_store %arg6[%c0_13, %c0_14], %23 {strides = array<i32>} : memref<8x32xf32, #tpu.memory_space<vmem>>, vector<8x32xf32>,
    %cst_15 = arith.constant 1.14285719 : f32
    %25 = vector.broadcast %cst_15 : f32 to vector<1x32xf32>
    %26 = arith.mulf %15, %25 : vector<1x32xf32>
    %cst_16 = arith.constant 0.899999976 : f32
    %27 = vector.broadcast %cst_16 : f32 to vector<1x32xf32>
    %28 = arith.mulf %27, %2 : vector<1x32xf32>
    %cst_17 = arith.constant 1.000000e-01 : f32
    %29 = vector.broadcast %cst_17 : f32 to vector<1x32xf32>
    %30 = arith.mulf %29, %8 : vector<1x32xf32>
    %31 = arith.addf %28, %30 : vector<1x32xf32>
    %c0_18 = arith.constant 0 : index
    %c0_19 = arith.constant 0 : index
    %32 = vector.load %arg7[%c0_18, %c0_19] : memref<1x32xf32, #tpu.memory_space<vmem>>, vector<1x32xf32>
    tpu.vector_store %arg7[%c0_18, %c0_19], %31 {strides = array<i32>} : memref<1x32xf32, #tpu.memory_space<vmem>>, vector<1x32xf32>,
    %cst_20 = arith.constant 0.899999976 : f32
    %33 = vector.broadcast %cst_20 : f32 to vector<1x32xf32>
    %34 = arith.mulf %33, %3 : vector<1x32xf32>
    %cst_21 = arith.constant 1.000000e-01 : f32
    %35 = vector.broadcast %cst_21 : f32 to vector<1x32xf32>
    %36 = arith.mulf %35, %26 : vector<1x32xf32>
    %37 = arith.addf %34, %36 : vector<1x32xf32>
    %c0_22 = arith.constant 0 : index
    %c0_23 = arith.constant 0 : index
    %38 = vector.load %arg8[%c0_22, %c0_23] : memref<1x32xf32, #tpu.memory_space<vmem>>, vector<1x32xf32>
    tpu.vector_store %arg8[%c0_22, %c0_23], %37 {strides = array<i32>} : memref<1x32xf32, #tpu.memory_space<vmem>>, vector<1x32xf32>,
    return
  }
  func.func @transform_0(%arg0: i32) -> (i32, i32) {
    %c0_i32 = arith.constant 0 : i32
    %c0_i32_0 = arith.constant 0 : i32
    return %c0_i32, %arg0 : i32, i32
  }
  func.func @transform_1(%arg0: i32) -> (i32, i32) {
    %c0_i32 = arith.constant 0 : i32
    %c0_i32_0 = arith.constant 0 : i32
    %c0_i32_1 = arith.constant 0 : i32
    return %c0_i32, %c0_i32_0 : i32, i32
  }
  func.func @transform_2(%arg0: i32) -> (i32, i32) {
    %c0_i32 = arith.constant 0 : i32
    %c0_i32_0 = arith.constant 0 : i32
    %c0_i32_1 = arith.constant 0 : i32
    return %c0_i32, %c0_i32_0 : i32, i32
  }
  func.func @transform_3(%arg0: i32) -> (i32, i32) {
    %c0_i32 = arith.constant 0 : i32
    %c0_i32_0 = arith.constant 0 : i32
    %c0_i32_1 = arith.constant 0 : i32
    return %c0_i32, %c0_i32_0 : i32, i32
  }
  func.func @transform_4(%arg0: i32) -> (i32, i32) {
    %c0_i32 = arith.constant 0 : i32
    %c0_i32_0 = arith.constant 0 : i32
    %c0_i32_1 = arith.constant 0 : i32
    return %c0_i32, %c0_i32_0 : i32, i32
  }
  func.func @transform_5(%arg0: i32) -> (i32, i32) {
    %c0_i32 = arith.constant 0 : i32
    %c0_i32_0 = arith.constant 0 : i32
    return %c0_i32, %arg0 : i32, i32
  }
  func.func @transform_6(%arg0: i32) -> (i32, i32) {
    %c0_i32 = arith.constant 0 : i32
    %c0_i32_0 = arith.constant 0 : i32
    return %c0_i32, %arg0 : i32, i32
  }
  func.func @transform_7(%arg0: i32) -> (i32, i32) {
    %c0_i32 = arith.constant 0 : i32
    %c0_i32_0 = arith.constant 0 : i32
    return %c0_i32, %arg0 : i32, i32
  }
}

</mosaic_0001>

<bundles_post_ra>
// kernel: tpu_custom_call.1
= control target key start
LH: loop header
LB: loop body
LE: loop exit
PB: predicated region body
PF: predicated region fallthrough
CT: control target
= control target key end

     0   :  { %13 = vsyncpa [#allocation3], 0  ;;  %s346_s0 = inlined_call_operand.hbm [shape: f32[8,32], index: 0, kind: input, shape index: {}]   ;;  %s347_s1 = inlined_call_operand.vmem [shape: f32[1,32], index: 1, kind: input, shape index: {}]   ;;  %s348_s2 = inlined_call_operand.vmem [shape: f32[1,32], index: 2, kind: input, shape index: {}]   ;;  %s349_s3 = inlined_call_operand.vmem [shape: f32[1,32], index: 3, kind: input, shape index: {}]   ;;  %s350_s4 = inlined_call_operand.vmem [shape: f32[1,32], index: 4, kind: input, shape index: {}]   ;;  %s351_s5 = inlined_call_operand.hbm [shape: f32[8,32], index: 5, kind: output, shape index: {0}]   ;;  %s352_s6 = inlined_call_operand.hbm [shape: f32[1,32], index: 6, kind: output, shape index: {1}]   ;;  %s353_s7 = inlined_call_operand.hbm [shape: f32[1,32], index: 7, kind: output, shape index: {2}]  }
   0x1   :  { %14 = vsyncpa [#allocation4], 0 }
   0x2   :  { %15 = vsyncpa [#allocation7], 0  ;;  %s232_s24 = smov [#allocation2]   ;;  %s138_s28 = scalar_lea.hbm %s346_s0, 128 }
   0x3   :  { %s22_s25 = sshll.u32 %s232_s24, 4  ;;  %p139_p0 = scmp.ne.s32.totalorder %s346_s0, %s138_s28  ;;  %s23_s25 = int_to_ptr.vmem [resolvable:$true] %s22_s25 }
   0x4   :  { %p142_p1 = scmp.lt.u32.totalorder %s138_s28, %s346_s0 }
   0x6   :  { %p144_p2 = pnand %p142_p1, %p139_p0 }
   0x8   :  { %147 = shalt.err (!%p144_p2)
}
   0x9   :  { %s148_s10 = scalar_lea.vmem %s23_s25, 128  ;;  %p153_p4 = scmp.lt.s32.totalorder %s23_s25, %s23_s25 }
   0xa   :  { %p149_p3 = scmp.ne.s32.totalorder %s23_s25, %s148_s10  ;;  %p154_p5 = scmp.lt.s32.totalorder %s148_s10, %s148_s10 }
   0xc   :  { %p155_p6 = por %p154_p5, %p153_p4 }
   0xe   :  { %p156_p7 = pnand %p155_p6, %p149_p3 }
  0x10   :  { %159 = shalt.err (!%p156_p7)
}
  0x11   :  { %25 = dma.hbm_to_vmem [thread:$0]  %s346_s0, 128, %s23_s25, [#allocation3]  }
  0x12   :  { %226 = dma.done.wait [#allocation3], 128  }
  0x13   :  { %227 = vsyncadd [#allocation3], 4294967168  ;;  %vm42_vm0 = vcmask 261120   ;;  %v41_v0 = vld [vmem:[#allocation2] sm:$0xff]  ;;  %s233_s15 = smov [#allocation6]   ;;  %vm83_vm1 = vcmask 253952  }
  0x14   :  { %v43_v1 = vsel %vm42_vm0, %v41_v0, 0.0  ;;  %v39_v7 = vld [vmem:[%s347_s1] sm:$0x1]  ;;  %s105_s0 = sshll.u32 %s233_s15, 4  ;;  %s106_s0 = int_to_ptr.vmem [resolvable:$true] %s105_s0 }
  0x15   :  { %v44_v2 = vrot.slane %v43_v1, 4  ;;  %v80_v10 = vmul.f32 0.9, %v39_v7  ;;  %s160_s1 = scalar_lea.vmem %s106_s0, 16  ;;  %s164_s16 = scalar_lea.vmem %s106_s0, 32 }
  0x16   :  { %p161_p8 = scmp.ne.s32.totalorder %s106_s0, %s160_s1  ;;  %p165_p9 = scmp.lt.s32.totalorder %s106_s0, %s106_s0 }
  0x17   :  { %v45_v3 = vadd.f32 %v44_v2, %v43_v1  ;;  %p166_p10 = scmp.lt.s32.totalorder %s164_s16, %s160_s1 }
  0x19   :  { %v46_v4 = vrot.slane %v45_v3, 2  ;;  %p167_p11 = por %p166_p10, %p165_p9 }
  0x1b   :  { %v47_v5 = vadd.f32 %v46_v4, %v45_v3  ;;  %p168_p12 = pnand %p167_p11, %p161_p8 }
  0x1d   :  { %v48_v6 = vrot.slane %v47_v5, 1 }
  0x1f   :  { %v49_v8 = vadd.f32 %v48_v6, %v47_v5 }
  0x21   :  { %v50_v9 = vmul.f32 0.125, %v49_v8 }
  0x23   :  { %v81_v11 = vmul.f32 0.1, %v50_v9  ;;  %v292_v12 = vsub.f32 %v41_v0, %v50_v9 }
  0x25   :  { %v82_v13 = vadd.f32 %v81_v11, %v80_v10  ;;  %v52_v14 = vmul.f32 %v292_v12, %v292_v12 }
  0x27   :  { %84 = vst.msk [vmem:[#allocation6] sm:$0x1] %vm83_vm1, %v82_v13  ;;  %v53_v15 = vsel %vm42_vm0, %v52_v14, 0.0 }
  0x28   :  { %v54_v16 = vrot.slane %v53_v15, 4 }
  0x29   :  { %171 = shalt.err (!%p168_p12)
}
  0x2a   :  { %s172_s19 = scalar_lea.hbm %s352_s6, 16 }
  0x2b   :  { %p173_p13 = scmp.ne.s32.totalorder %s352_s6, %s172_s19  ;;  %p176_p0 = scmp.lt.u32.totalorder %s172_s19, %s352_s6 }
  0x2d   :  { %p178_p1 = pnand %p176_p0, %p173_p13 }
  0x2f   :  { %181 = shalt.err (!%p178_p1)
}
  0x30   :  { %108 = dma.vmem_to_hbm [thread:$0]  %s106_s0, 16, %s352_s6, [#allocation7]   ;;  %v55_v17 = vadd.f32 %v54_v16, %v53_v15  ;;  %v40_v22 = vld [vmem:[%s348_s2] sm:$0x1]  ;;  %v65_v28 = vlaneseq }
  0x31   :  { %v85_v26 = vmul.f32 0.9, %v40_v22  ;;  %s234_s28 = smov [#allocation8]  }
  0x32   :  { %v56_v18 = vrot.slane %v55_v17, 2  ;;  %s115_s29 = sshll.u32 %s234_s28, 4  ;;  %v66_v30 = vshrl.u32 %v65_v28, 7  ;;  %s116_s29 = int_to_ptr.vmem [resolvable:$true] %s115_s29 }
  0x33   :  { %s182_s6 = scalar_lea.vmem %s116_s29, 16  ;;  %s186_s30 = scalar_lea.vmem %s116_s29, 32 }
  0x34   :  { %v57_v19 = vadd.f32 %v56_v18, %v55_v17  ;;  %p183_p2 = scmp.ne.s32.totalorder %s116_s29, %s182_s6  ;;  %p187_p3 = scmp.lt.s32.totalorder %s116_s29, %s116_s29 }
  0x35   :  { %p188_p4 = scmp.lt.s32.totalorder %s186_s30, %s182_s6 }
  0x36   :  { %v58_v20 = vrot.slane %v57_v19, 1 }
  0x37   :  { %p189_p5 = por %p188_p4, %p187_p3 }
  0x38   :  { %v59_v21 = vadd.f32 %v58_v20, %v57_v19 }
  0x39   :  { %p190_p6 = pnand %p189_p5, %p183_p2 }
  0x3a   :  { %v60_v23 = vmul.f32 0.125, %v59_v21 }
  0x3c   :  { %v61_v24 = vadd.f32 1e-05, %v60_v23  ;;  %v79_v25 = vmul.f32 1.1428572, %v60_v23 }
  0x3e   :  { %136 = vrsqrt.f32 %v61_v24  ;;  %v86_v27 = vmul.f32 0.1, %v79_v25 }
  0x40   :  { %v87_v29 = vadd.f32 %v86_v27, %v85_v26 }
  0x42   :  { %88 = vst.msk [vmem:[#allocation8] sm:$0x1] %vm83_vm1, %v87_v29 }
  0x43   :  { %193 = shalt.err (!%p190_p6)
}
  0x44   :  { %s194_s9 = scalar_lea.hbm %s353_s7, 16 }
  0x45   :  { %p195_p7 = scmp.ne.s32.totalorder %s353_s7, %s194_s9  ;;  %p198_p8 = scmp.lt.u32.totalorder %s194_s9, %s353_s7 }
  0x47   :  { %p200_p9 = pnand %p198_p8, %p195_p7 }
  0x49   :  { %203 = shalt.err (!%p200_p9)
}
  0x4a   :  { %118 = dma.vmem_to_hbm [thread:$0]  %s116_s29, 16, %s353_s7, [#allocation7]   ;;  %v37_v31 = vld [vmem:[%s349_s3] sm:$0x1]  ;;  %v67_v32 = vsub.s32 0, %v66_v30  ;;  %v137_v33 = vpop.eup %136 }
  0x4b   :  { %v63_v34 = vmul.f32 %v137_v33, %v37_v31  ;;  %v131_v36 = vld [vmem:[%s350_s4] ss:$0 sm:$0xff]  ;;  %s235_s18 = smov [#allocation5]  }
  0x4c   :  { %s95_s19 = sshll.u32 %s235_s18, 4  ;;  %s96_s19 = int_to_ptr.vmem [resolvable:$true] %s95_s19 }
  0x4d   :  { %v68_v35 = vrot.slane %v63_v34, %v67_v32  ;;  %s204_s7 = scalar_lea.vmem %s96_s19, 128  ;;  %p209_p11 = scmp.lt.s32.totalorder %s96_s19, %s96_s19 }
  0x4e   :  { %p205_p10 = scmp.ne.s32.totalorder %s96_s19, %s204_s7  ;;  %p210_p12 = scmp.lt.s32.totalorder %s204_s7, %s204_s7 }
  0x4f   :  { %v70_v37 = vmul.f32 %v68_v35, %v292_v12 }
  0x50   :  { %p211_p13 = por %p210_p12, %p209_p11 }
  0x51   :  { %v77_v38 = vadd.f32 %v131_v36, %v70_v37 }
  0x52   :  { %p212_p0 = pnand %p211_p13, %p205_p10 }
  0x53   :  { %78 = vst.msk [vmem:[#allocation5] sm:$0xff] %vm42_vm0, %v77_v38 }
  0x54   :  { %215 = shalt.err (!%p212_p0)
}
  0x55   :  { %s216_s21 = scalar_lea.hbm %s351_s5, 128 }
  0x56   :  { %p217_p1 = scmp.ne.s32.totalorder %s351_s5, %s216_s21  ;;  %p220_p2 = scmp.lt.u32.totalorder %s216_s21, %s351_s5 }
  0x58   :  { %p222_p3 = pnand %p220_p2, %p217_p1 }
  0x5a   :  { %225 = shalt.err (!%p222_p3)
}
  0x5b   :  { %98 = dma.vmem_to_hbm [thread:$0]  %s96_s19, 128, %s351_s5, [#allocation4]  }
  0x5c   :  { %228 = dma.done.wait [#allocation4], 128  }
  0x5d   :  { %229 = vsyncadd [#allocation4], 4294967168 }
  0x5e   :  { %230 = dma.done.wait [#allocation7], 32  }
  0x5f   :  { %231 = vsyncadd [#allocation7], 4294967264 }
  0x60   :  { %128 = vsyncpa [#allocation3], 1 }
  0x61   :  { %129 = vsyncpa [#allocation4], 1 }
  0x62   :  { %130 = vsyncpa [#allocation7], 1 }

</bundles_post_ra>
